<compile_context>
chip_gen: v6e
topology: v6e:2x2x1
jax: 0.10.0
libtpu: 0.0.40
codegen_flags: <defaults>
</compile_context>

<pallas_src>
import jax
import jax.numpy as jnp
from jax.experimental import pallas as pl
from jax.experimental.pallas import tpu as pltpu

EPS = 1e-6
BETA = 1.0
STATS_W = 8          # lane-dense stats slab width: [precise, recall, fs, pad...]


def f_softmax_kernel(labels_ref, logits_ref, stats_ref):
    labels = labels_ref[...].astype(jnp.float32)          # [TB, C]
    logits = logits_ref[...].astype(jnp.float32)          # [TB, C]
    C = logits.shape[-1]

    # Numerically stable softmax statistics; p = e / s is never materialized.
    # Only the per-row max remains on the XLU.
    m = jnp.max(logits, axis=1, keepdims=True)            # [TB, 1]  (XLU)
    e = jnp.exp(logits - m)                                # [TB, C]  (EUP)

    # Linear lane reductions -> MXU matvecs against a resident ones[C, 1] RHS.
    # HIGHEST precision keeps the f32 accumulation equivalent to a plain sum.
    ones_c = jnp.ones((C, 1), jnp.float32)

    def rowsum(x):
        return jnp.dot(x, ones_c,
                       preferred_element_type=jnp.float32,
                       precision=jax.lax.Precision.HIGHEST)

    s = rowsum(e)                                          # [TB, 1]  sum(exp)
    t = rowsum(labels * e)                                 # [TB, 1]  sum(l*exp)
    lbl_sum = rowsum(labels)                               # [TB, 1]  sum(l)

    # sum(softmax) == 1 exactly up to f32 ulps (documented assumption; the
    # reference's explicit sum differs by ~1e-7 relative, well inside 1e-5).
    tp = t / s
    precise = tp * (1.0 / (1.0 + EPS))
    recall = tp / (lbl_sum + EPS)
    beta2 = BETA * BETA
    fs = (1.0 + beta2) * precise * recall / (beta2 * precise + recall + EPS)

    # Pack per-row outputs into one lane-dense slab: col0=precise, col1=recall,
    # col2=fs, rest zero.  Single block store per tile.
    col = jax.lax.broadcasted_iota(jnp.int32, stats_ref.shape, 1)
    stats_ref[...] = jnp.where(col == 0, precise,
                     jnp.where(col == 1, recall,
                     jnp.where(col == 2, fs, 0.0)))


def _vmem_budgets():
    """(tile-sizing budget, vmem_limit_bytes), generation-aware."""
    budget, limit = 24 << 20, 32 << 20            # conservative / v7x-safe default
    try:
        cap = pltpu.get_tpu_info().vmem_capacity_bytes
        if cap is not None and cap >= (96 << 20):  # v5e/v6e: 128 MiB physical VMEM
            budget, limit = 48 << 20, 64 << 20
    except Exception:
        pass                                       # keep conservative defaults
    return budget, limit


def _pick_batch_tile(B, C, labels_itemsize, logits_itemsize, vmem_budget_bytes):
    # Per-row VMEM bill:
    #   * 2x double-buffered label + logit input blocks,
    #   * 2x double-buffered f32 stats output rows,
    #   * ~16*C bytes of live f32 temporaries in the body
    #     (upcast labels, upcast logits, e = exp(...), labels*e).
    per_row = (2 * (labels_itemsize + logits_itemsize) * C
               + 16 * C
               + 2 * 4 * STATS_W)
    tb = vmem_budget_bytes // max(per_row, 1)
    # 512-row tiles already reach ~85% of the HBM roofline; larger tiles only
    # eat VMEM and can collapse the grid to one step (starving a v7x core).
    tb = min(tb, 1024)
    if tb >= B:
        if B <= 32:
            return B                     # tiny batch: one full-extent block
        tb = pl.cdiv(B, 2)               # guarantee >=2 grid steps for megacore
    tb = max(16, (tb // 16) * 16)        # lcm of f32(8)/bf16(16) sublane tiles
    return min(tb, B)


def differenciable_f_softmax(labels, logits, mean=False):
    """labels, logits: [B, C].  Returns (1-loss, precise, recall) or 1-loss."""
    B, C = logits.shape
    budget, vmem_limit = _vmem_budgets()
    tb = _pick_batch_tile(B, C, labels.dtype.itemsize, logits.dtype.itemsize,
                          budget)
    grid = (pl.cdiv(B, tb),)

    stats = pl.pallas_call(
        f_softmax_kernel,
        out_shape=jax.ShapeDtypeStruct((B, STATS_W), jnp.float32),
        grid_spec=pltpu.PrefetchScalarGridSpec(
            num_scalar_prefetch=0,
            grid=grid,
            in_specs=[
                pl.BlockSpec((tb, C), lambda i: (i, 0)),
                pl.BlockSpec((tb, C), lambda i: (i, 0)),
            ],
            out_specs=pl.BlockSpec((tb, STATS_W), lambda i: (i, 0)),
        ),
        compiler_params=pltpu.CompilerParams(
            dimension_semantics=("parallel",),   # row-parallel; megacore-friendly
            vmem_limit_bytes=vmem_limit,
        ),
    )(labels, logits)

    precise = stats[:, 0]
    recall = stats[:, 1]
    fs = stats[:, 2]
    loss = 1.0 - jnp.sum(fs) / B                 # finish scalar loss in wrapper
    if mean:
        return loss
    return loss, precise, recall
    # TODO(synk): if production C << 128, pack k rows per vreg (view inputs as
    # (B/k, k*C) with k*C a multiple of 128) or fuse this into the surrounding
    # graph; a standalone kernel is overhead-bound at tiny C.


def _reference(labels, logits, eps=EPS, beta=BETA):
    labels = labels.astype(jnp.float32)
    logits = logits.astype(jnp.float32)
    B = logits.shape[0]
    p = jax.nn.softmax(logits, axis=1)
    num_pos = jnp.sum(p, axis=1) + eps
    num_pos_hat = jnp.sum(labels, axis=1) + eps
    tp = jnp.sum(labels * p, axis=1)
    precise = tp / num_pos
    recall = tp / num_pos_hat
    fs = (1 + beta * beta) * precise * recall / (beta * beta * precise + recall + eps)
    loss = fs.sum() / B
    return 1 - loss, precise, recall


if __name__ == "__main__":
    key = jax.random.PRNGKey(0)
    k1, k2 = jax.random.split(key)
    B, C = 8, 128
    logits = jax.random.normal(k1, (B, C), dtype=jnp.float32)
    # one-hot labels kept in bf16 (exact 0/1) to halve the label HBM stream;
    # soft labels are also supported (bf16 quantizes them to ~3 digits).
    cls = jax.random.randint(k2, (B,), 0, C)
    labels = jax.nn.one_hot(cls, C, dtype=jnp.bfloat16)

    loss, precise, recall = differenciable_f_softmax(labels, logits)
    jax.block_until_ready((loss, precise, recall))

    ref_loss, ref_p, ref_r = _reference(labels, logits)
    assert jnp.allclose(loss, ref_loss, atol=1e-5), (loss, ref_loss)
    assert jnp.allclose(precise, ref_p, atol=1e-5)
    assert jnp.allclose(recall, ref_r, atol=1e-5)

    # also exercise the mean=True path
    only_loss = differenciable_f_softmax(labels, logits, mean=True)
    jax.block_until_ready(only_loss)
    assert jnp.allclose(only_loss, ref_loss, atol=1e-5)

    print("KERNEL_OK")
</pallas_src>

<mosaic_0001>
module attributes {stable_mosaic.version = 11 : i64} {
  func.func @f_softmax_kernel(%arg0: i32, %arg1: memref<8x128xbf16, #tpu.memory_space<vmem>>, %arg2: memref<8x128xf32, #tpu.memory_space<vmem>>, %arg3: memref<8x8xf32, #tpu.memory_space<vmem>>) attributes {dimension_semantics = [#tpu.dimension_semantics<parallel>], iteration_bounds = array<i64: 1>, scalar_prefetch = 0 : i64, scratch_operands = 0 : i64, tpu.core_type = #tpu.core_type<tc>, window_params = [{transform_indices = @transform_0, window_bounds = array<i64: 8, 128>}, {transform_indices = @transform_1, window_bounds = array<i64: 8, 128>}, {transform_indices = @transform_2, window_bounds = array<i64: 8, 8>}]} {
    %c0 = arith.constant 0 : index
    %c0_0 = arith.constant 0 : index
    %0 = vector.load %arg1[%c0, %c0_0] : memref<8x128xbf16, #tpu.memory_space<vmem>>, vector<8x128xbf16>
    %1 = arith.extf %0 : vector<8x128xbf16> to vector<8x128xf32>
    %c0_1 = arith.constant 0 : index
    %c0_2 = arith.constant 0 : index
    %2 = vector.load %arg2[%c0_1, %c0_2] : memref<8x128xf32, #tpu.memory_space<vmem>>, vector<8x128xf32>
    %cst = arith.constant dense<0xFF800000> : vector<8xf32>
    %3 = vector.multi_reduction <maximumf>, %2, %cst [1] : vector<8x128xf32> to vector<8xf32>
    %4 = vector.shape_cast %3 : vector<8xf32> to vector<8x1xf32>
    %5 = vector.broadcast %4 : vector<8x1xf32> to vector<8x128xf32>
    %6 = arith.subf %2, %5 : vector<8x128xf32>
    %7 = math.exp %6 : vector<8x128xf32>
    %cst_3 = arith.constant 1.000000e+00 : f32
    %8 = vector.broadcast %cst_3 : f32 to vector<128x1xf32>
    %cst_4 = arith.constant dense<0.000000e+00> : vector<8x1xf32>
    %9 = tpu.matmul %7, %8, %cst_4 {dimension_numbers = #tpu.dot_dimension_numbers<[1], [0], [0], [1], [0, 0, 1, 1], [], []>, precision = #tpu.contract_precision<fp32>} : vector<8x128xf32>, vector<128x1xf32>, vector<8x1xf32> -> vector<8x1xf32>
    %10 = arith.mulf %1, %7 : vector<8x128xf32>
    %cst_5 = arith.constant dense<0.000000e+00> : vector<8x1xf32>
    %11 = tpu.matmul %10, %8, %cst_5 {dimension_numbers = #tpu.dot_dimension_numbers<[1], [0], [0], [1], [0, 0, 1, 1], [], []>, precision = #tpu.contract_precision<fp32>} : vector<8x128xf32>, vector<128x1xf32>, vector<8x1xf32> -> vector<8x1xf32>
    %cst_6 = arith.constant dense<0.000000e+00> : vector<8x1xf32>
    %12 = tpu.matmul %1, %8, %cst_6 {dimension_numbers = #tpu.dot_dimension_numbers<[1], [0], [0], [1], [0, 0, 1, 1], [], []>, precision = #tpu.contract_precision<fp32>} : vector<8x128xf32>, vector<128x1xf32>, vector<8x1xf32> -> vector<8x1xf32>
    %13 = arith.divf %11, %9 : vector<8x1xf32>
    %cst_7 = arith.constant 0.999998986 : f32
    %14 = vector.broadcast %cst_7 : f32 to vector<8x1xf32>
    %15 = arith.mulf %13, %14 : vector<8x1xf32>
    %cst_8 = arith.constant 9.99999997E-7 : f32
    %16 = vector.broadcast %cst_8 : f32 to vector<8x1xf32>
    %17 = arith.addf %12, %16 : vector<8x1xf32>
    %18 = arith.divf %13, %17 : vector<8x1xf32>
    %cst_9 = arith.constant 2.000000e+00 : f32
    %19 = vector.broadcast %cst_9 : f32 to vector<8x1xf32>
    %20 = arith.mulf %19, %15 : vector<8x1xf32>
    %21 = arith.mulf %20, %18 : vector<8x1xf32>
    %cst_10 = arith.constant 1.000000e+00 : f32
    %22 = vector.broadcast %cst_10 : f32 to vector<8x1xf32>
    %23 = arith.mulf %22, %15 : vector<8x1xf32>
    %24 = arith.addf %23, %18 : vector<8x1xf32>
    %cst_11 = arith.constant 9.99999997E-7 : f32
    %25 = vector.broadcast %cst_11 : f32 to vector<8x1xf32>
    %26 = arith.addf %24, %25 : vector<8x1xf32>
    %27 = arith.divf %21, %26 : vector<8x1xf32>
    %28 = tpu.iota {dimensions = array<i32: 1>} : vector<8x8xi32>
    %c0_i32 = arith.constant 0 : i32
    %29 = vector.broadcast %c0_i32 : i32 to vector<8x8xi32>
    %30 = arith.cmpi eq, %28, %29 : vector<8x8xi32>
    %c1_i32 = arith.constant 1 : i32
    %31 = vector.broadcast %c1_i32 : i32 to vector<8x8xi32>
    %32 = arith.cmpi eq, %28, %31 : vector<8x8xi32>
    %c2_i32 = arith.constant 2 : i32
    %33 = vector.broadcast %c2_i32 : i32 to vector<8x8xi32>
    %34 = arith.cmpi eq, %28, %33 : vector<8x8xi32>
    %cst_12 = arith.constant 0.000000e+00 : f32
    %35 = vector.shape_cast %27 : vector<8x1xf32> to vector<8x1xf32>
    %36 = vector.broadcast %35 : vector<8x1xf32> to vector<8x8xf32>
    %37 = vector.broadcast %cst_12 : f32 to vector<8x8xf32>
    %38 = arith.select %34, %36, %37 : vector<8x8xi1>, vector<8x8xf32>
    %39 = vector.shape_cast %18 : vector<8x1xf32> to vector<8x1xf32>
    %40 = vector.broadcast %39 : vector<8x1xf32> to vector<8x8xf32>
    %41 = arith.select %32, %40, %38 : vector<8x8xi1>, vector<8x8xf32>
    %42 = vector.shape_cast %15 : vector<8x1xf32> to vector<8x1xf32>
    %43 = vector.broadcast %42 : vector<8x1xf32> to vector<8x8xf32>
    %44 = arith.select %30, %43, %41 : vector<8x8xi1>, vector<8x8xf32>
    %c0_13 = arith.constant 0 : index
    %c0_14 = arith.constant 0 : index
    %45 = vector.load %arg3[%c0_13, %c0_14] : memref<8x8xf32, #tpu.memory_space<vmem>>, vector<8x8xf32>
    tpu.vector_store %arg3[%c0_13, %c0_14], %44 {strides = array<i32>} : memref<8x8xf32, #tpu.memory_space<vmem>>, vector<8x8xf32>,
    return
  }
  func.func @transform_0(%arg0: i32) -> (i32, i32) {
    %c0_i32 = arith.constant 0 : i32
    %c0_i32_0 = arith.constant 0 : i32
    return %arg0, %c0_i32 : i32, i32
  }
  func.func @transform_1(%arg0: i32) -> (i32, i32) {
    %c0_i32 = arith.constant 0 : i32
    %c0_i32_0 = arith.constant 0 : i32
    return %arg0, %c0_i32 : i32, i32
  }
  func.func @transform_2(%arg0: i32) -> (i32, i32) {
    %c0_i32 = arith.constant 0 : i32
    %c0_i32_0 = arith.constant 0 : i32
    return %arg0, %c0_i32 : i32, i32
  }
}

</mosaic_0001>

<bundles_post_ra>
// kernel: tpu_custom_call.1
= control target key start
LH: loop header
LB: loop body
LE: loop exit
PB: predicated region body
PF: predicated region fallthrough
CT: control target
= control target key end

     0   :  { %7 = vsyncpa [#allocation3], 0  ;;  %s2420_s0 = inlined_call_operand.hbm [shape: bf16[8,128], index: 0, kind: input, shape index: {}]   ;;  %s2421_s1 = inlined_call_operand.hbm [shape: f32[8,128], index: 1, kind: input, shape index: {}]   ;;  %s2422_s2 = inlined_call_operand.hbm [shape: f32[8,8], index: 2, kind: output, shape index: {}]  }
   0x1   :  { %8 = vsyncpa [#allocation6], 0 }
   0x2   :  { %9 = vsyncpa [#allocation4], 0  ;;  %s2004_s9 = smov [#allocation2]   ;;  %s2005_s11 = smov [#allocation5]  }
   0x3   :  { %s16_s10 = sshll.u32 %s2004_s9, 4  ;;  %s26_s12 = sshll.u32 %s2005_s11, 4  ;;  %s17_s10 = int_to_ptr.vmem [resolvable:$true] %s16_s10  ;;  %s27_s12 = int_to_ptr.vmem [resolvable:$true] %s26_s12 }
   0x4   :  { %s1946_s13 = scalar_lea.vmem %s17_s10, 64  ;;  %p1951_p1 = scmp.lt.s32.totalorder %s17_s10, %s17_s10 }
   0x5   :  { %p1947_p0 = scmp.ne.s32.totalorder %s17_s10, %s1946_s13  ;;  %p1952_p2 = scmp.lt.s32.totalorder %s1946_s13, %s1946_s13 }
   0x7   :  { %p1953_p3 = por %p1952_p2, %p1951_p1 }
   0x9   :  { %p1954_p4 = pnand %p1953_p3, %p1947_p0 }
   0xb   :  { %1957 = shalt.err (!%p1954_p4)
}
   0xc   :  { %19 = dma.hbm_to_vmem [thread:$0]  %s2420_s0, 64, %s17_s10, [#allocation3]  }
   0xd   :  { %s1966_s16 = scalar_lea.vmem %s27_s12, 128  ;;  %p1971_p6 = scmp.lt.s32.totalorder %s27_s12, %s27_s12 }
   0xe   :  { %p1967_p5 = scmp.ne.s32.totalorder %s27_s12, %s1966_s16  ;;  %p1972_p7 = scmp.lt.s32.totalorder %s1966_s16, %s1966_s16 }
  0x10   :  { %p1973_p8 = por %p1972_p7, %p1971_p6 }
  0x12   :  { %p1974_p9 = pnand %p1973_p8, %p1967_p5 }
  0x14   :  { %1977 = shalt.err (!%p1974_p9)
}
  0x15   :  { %29 = dma.hbm_to_vmem [thread:$0]  %s2421_s1, 128, %s27_s12, [#allocation6]  }
  0x16   :  { %1998 = dma.done.wait [#allocation3], 64  }
  0x17   :  { %1999 = vsyncadd [#allocation3], 4294967232 }
  0x18   :  { %2000 = dma.done.wait [#allocation6], 128  }
  0x19   :  { %2001 = vsyncadd [#allocation6], 4294967168  ;;  %v2006_v0 = vmov 0.0   ;;  %v2007_v1 = vmov 1.0   ;;  %v38_v2 = vld [vmem:[#allocation5] sm:$0xff]  ;;  %vm2008_vm0 = vmmov 0  }
  0x1a   :  { %1561 = vmatprep.subr.mxu0 %v2006_v0  ;;  %1596 = vmatprep.subr.mxu1 %v2006_v0  ;;  %v36_v12 = vld [vmem:[#allocation2] sm:$0xf]  ;;  %v2009_v35 = vmov 0   ;;  %s2010_s0 = smov [#allocation7]   ;;  %vm1372_vm4 = vcmask 64512  }
  0x1b   :  { %1562 = vmatpush3.msra.mxu0 %v2007_v1  ;;  %1597 = vmatpush3.msra.mxu1 %v2006_v0  ;;  %v2178_v13 = vunpack.c.l.bf16 %v36_v12  ;;  %s1380_s1 = sshll.u32 %s2010_s0, 4  ;;  %s1381_s1 = int_to_ptr.vmem [resolvable:$true] %s1380_s1 }
  0x1c   :  { %1563 = vmatprep.subr.mxu0 %v2006_v0  ;;  %1601 = vmatprep.subr.mxu1 %v2006_v0  ;;  %s1978_s19 = scalar_lea.vmem %s1381_s1, 128  ;;  %p1983_p11 = scmp.lt.s32.totalorder %s1381_s1, %s1381_s1 }
  0x1d   :  { %1564 = vmatpush3.msra.mxu0 %v2007_v1  ;;  %39 = vmax.xlane.f32.xlu0 %v38_v2  ;;  %v2289_v20 = vsub.f32 %v2178_v13, %v2178_v13  ;;  %p1979_p10 = scmp.ne.s32.totalorder %s1381_s1, %s1978_s19  ;;  %p1984_p12 = scmp.lt.s32.totalorder %s1978_s19, %s1978_s19 }
  0x1e   :  { %1565 = vmatprep.subr.mxu0 %v2006_v0  ;;  %1598 = vmatprep.mubr.msk.f32.mxu1 %vm2008_vm0, %v2006_v0 }
  0x1f   :  { %1566 = vmatpush3.msra.mxu0 %v2007_v1  ;;  %1593 = vmatprep.mubr.msk.f32.mxu0 %vm2008_vm0, %v2006_v0  ;;  %v980_v21 = vand.u32 4294901760, %v2289_v20  ;;  %p1985_p13 = por %p1984_p12, %p1983_p11 }
  0x20   :  { %1567 = vmatprep.subr.mxu0 %v2006_v0  ;;  %1929 = vset.pattern.permute.xlu1 %v2009_v35 }
  0x21   :  { %1568 = vmatpush3.msra.mxu0 %v2007_v1  ;;  %v981_v22 = vsub.f32 %v2289_v20, %v980_v21  ;;  %1928 = vset.pattern.permute.xlu0 %v2009_v35  ;;  %p1986_p0 = pnand %p1985_p13, %p1979_p10 }
  0x22   :  { %1569 = vmatprep.subr.mxu0 %v2006_v0 }
  0x23   :  { %1570 = vmatpush3.msra.mxu0 %v2007_v1  ;;  %v982_v23 = vand.u32 4294901760, %v981_v22 }
  0x24   :  { %1571 = vmatprep.subr.mxu0 %v2006_v0 }
  0x25   :  { %1572 = vmatpush3.msra.mxu0 %v2007_v1 }
  0x26   :  { %1573 = vmatprep.subr.mxu0 %v2006_v0 }
  0x27   :  { %1574 = vmatpush3.msra.mxu0 %v2007_v1 }
  0x28   :  { %1575 = vmatprep.subr.mxu0 %v2006_v0 }
  0x29   :  { %1576 = vmatpush3.msra.mxu0 %v2007_v1 }
  0x2a   :  { %1577 = vmatprep.subr.mxu0 %v2006_v0 }
  0x2b   :  { %1578 = vmatpush3.msra.mxu0 %v2007_v1 }
  0x2c   :  { %1579 = vmatprep.subr.mxu0 %v2006_v0 }
  0x2d   :  { %1580 = vmatpush3.msra.mxu0 %v2007_v1 }
  0x2e   :  { %1581 = vmatprep.subr.mxu0 %v2006_v0 }
  0x2f   :  { %1582 = vmatpush3.msra.mxu0 %v2007_v1 }
  0x30   :  { %1583 = vmatprep.subr.mxu0 %v2006_v0 }
  0x31   :  { %1584 = vmatpush3.msra.mxu0 %v2007_v1 }
  0x32   :  { %1585 = vmatprep.subr.mxu0 %v2006_v0 }
  0x33   :  { %1586 = vmatpush3.msra.mxu0 %v2007_v1 }
  0x34   :  { %1587 = vmatprep.subr.mxu0 %v2006_v0 }
  0x35   :  { %1588 = vmatpush3.msra.mxu0 %v2007_v1 }
  0x36   :  { %1589 = vmatprep.subr.mxu0 %v2006_v0 }
  0x37   :  { %1590 = vmatpush3.msra.mxu0 %v2007_v1 }
  0x38   :  { %1591 = vmatprep.subr.mxu0 %v2006_v0 }
  0x39   :  { %1592 = vmatpush3.msra.mxu0 %v2007_v1 }
  0x3a   :  { %1646 = vmatprep.subr.mxu0 %v2006_v0 }
  0xa6   :  { %v40_v3 = vpop.xlane.xlu0 %39 }
  0xa7   :  { %v41_v4 = vsub.f32 %v38_v2, %v40_v3 }
  0xa9   :  { %v42_v5 = vmul.f32 1.442695, %v41_v4 }
  0xab   :  { %1930 = vpow2.f32 %v42_v5 }
  0xb8   :  { %v2072_v6 = vpop.eup %1930 }
  0xb9   :  { %v2075_v7 = vand.u32 4294901760, %v2072_v6  ;;  %v477_v14 = vmul.f32 %v2072_v6, %v2178_v13 }
  0xbb   :  { %1599 = vmatmul.mubr.f32.vlgmr.msra.gmra.mxu1 %v2075_v7  ;;  %v2080_v8 = vsub.f32 %v2072_v6, %v2075_v7  ;;  %v2198_v15 = vand.u32 4294901760, %v477_v14 }
  0xbc   :  { %1602 = vmatpush3.msra.mxu1 %v2006_v0  ;;  %1603 = vmatprep.mubr.msk.f32.mxu1 %vm2008_vm0, %v2006_v0 }
  0xbd   :  { %1606 = vmatprep.subr.mxu1 %v2006_v0  ;;  %v111_v9 = vand.u32 4294901760, %v2080_v8  ;;  %v544_v16 = vsub.f32 %v477_v14, %v2198_v15 }
  0xbf   :  { %1604 = vmatmul.mubr.f32.vlgmr.msra.gmra.mxu1 %v2080_v8  ;;  %v112_v10 = vsub.f32 %v2080_v8, %v111_v9  ;;  %v545_v17 = vand.u32 4294901760, %v544_v16 }
  0xc0   :  { %1607 = vmatpush3.msra.mxu1 %v2007_v1  ;;  %1638 = vmatprep.mubr.msk.f32.mxu1 %vm2008_vm0, %v2006_v0 }
  0xc1   :  { %1608 = vmatprep.subr.mxu1 %v2006_v0  ;;  %v113_v11 = vand.u32 4294901760, %v112_v10  ;;  %v546_v18 = vsub.f32 %v544_v16, %v545_v17 }
  0xc2   :  { %1609 = vmatpush3.msra.mxu1 %v2007_v1 }
  0xc3   :  { %1610 = vmatprep.subr.mxu1 %v2006_v0  ;;  %1594 = vmatmul.mubr.f32.vlgmr.msra.gmra.mxu0 %v113_v11  ;;  %v547_v19 = vand.u32 4294901760, %v546_v18 }
  0xc4   :  { %1611 = vmatpush3.msra.mxu1 %v2007_v1  ;;  %1647 = vmatpush3.msra.mxu0 %v2007_v1 }
  0xc5   :  { %1612 = vmatprep.subr.mxu1 %v2006_v0  ;;  %1648 = vmatprep.subr.mxu0 %v2006_v0 }
  0xc6   :  { %1613 = vmatpush3.msra.mxu1 %v2007_v1  ;;  %1649 = vmatpush3.msra.mxu0 %v2007_v1 }
  0xc7   :  { %1614 = vmatprep.subr.mxu1 %v2006_v0  ;;  %1650 = vmatprep.subr.mxu0 %v2006_v0 }
  0xc8   :  { %1615 = vmatpush3.msra.mxu1 %v2007_v1  ;;  %1651 = vmatpush3.msra.mxu0 %v2007_v1 }
  0xc9   :  { %1616 = vmatprep.subr.mxu1 %v2006_v0  ;;  %1652 = vmatprep.subr.mxu0 %v2006_v0 }
  0xca   :  { %1617 = vmatpush3.msra.mxu1 %v2007_v1  ;;  %1653 = vmatpush3.msra.mxu0 %v2007_v1 }
  0xcb   :  { %1618 = vmatprep.subr.mxu1 %v2006_v0  ;;  %1654 = vmatprep.subr.mxu0 %v2006_v0 }
  0xcc   :  { %1619 = vmatpush3.msra.mxu1 %v2007_v1  ;;  %1655 = vmatpush3.msra.mxu0 %v2007_v1 }
  0xcd   :  { %1620 = vmatprep.subr.mxu1 %v2006_v0  ;;  %1656 = vmatprep.subr.mxu0 %v2006_v0 }
  0xce   :  { %1621 = vmatpush3.msra.mxu1 %v2007_v1  ;;  %1657 = vmatpush3.msra.mxu0 %v2007_v1 }
  0xcf   :  { %1622 = vmatprep.subr.mxu1 %v2006_v0  ;;  %1658 = vmatprep.subr.mxu0 %v2006_v0 }
  0xd0   :  { %1623 = vmatpush3.msra.mxu1 %v2007_v1  ;;  %1659 = vmatpush3.msra.mxu0 %v2007_v1 }
  0xd1   :  { %1624 = vmatprep.subr.mxu1 %v2006_v0  ;;  %1660 = vmatprep.subr.mxu0 %v2006_v0 }
  0xd2   :  { %1625 = vmatpush3.msra.mxu1 %v2007_v1  ;;  %1661 = vmatpush3.msra.mxu0 %v2007_v1 }
  0xd3   :  { %1626 = vmatprep.subr.mxu1 %v2006_v0  ;;  %1662 = vmatprep.subr.mxu0 %v2006_v0 }
  0xd4   :  { %1627 = vmatpush3.msra.mxu1 %v2007_v1  ;;  %1663 = vmatpush3.msra.mxu0 %v2007_v1 }
  0xd5   :  { %1628 = vmatprep.subr.mxu1 %v2006_v0  ;;  %1664 = vmatprep.subr.mxu0 %v2006_v0 }
  0xd6   :  { %1629 = vmatpush3.msra.mxu1 %v2007_v1  ;;  %1665 = vmatpush3.msra.mxu0 %v2007_v1 }
  0xd7   :  { %1630 = vmatprep.subr.mxu1 %v2006_v0  ;;  %1666 = vmatprep.subr.mxu0 %v2006_v0 }
  0xd8   :  { %1631 = vmatpush3.msra.mxu1 %v2007_v1  ;;  %1667 = vmatpush3.msra.mxu0 %v2007_v1 }
  0xd9   :  { %1632 = vmatprep.subr.mxu1 %v2006_v0  ;;  %1668 = vmatprep.subr.mxu0 %v2006_v0 }
  0xda   :  { %1633 = vmatpush3.msra.mxu1 %v2007_v1  ;;  %1669 = vmatpush3.msra.mxu0 %v2007_v1 }
  0xdb   :  { %1634 = vmatprep.subr.mxu1 %v2006_v0  ;;  %1670 = vmatprep.subr.mxu0 %v2006_v0 }
  0xdc   :  { %1635 = vmatpush3.msra.mxu1 %v2007_v1  ;;  %1671 = vmatpush3.msra.mxu0 %v2007_v1 }
  0xdd   :  { %1636 = vmatprep.subr.mxu1 %v2006_v0  ;;  %1672 = vmatprep.subr.mxu0 %v2006_v0 }
  0xde   :  { %1637 = vmatpush3.msra.mxu1 %v2007_v1  ;;  %1673 = vmatpush3.msra.mxu0 %v2007_v1 }
  0xdf   :  { %1639 = vmatmul.mubr.f32.vlgmr.msra.gmra.mxu1 %v111_v9  ;;  %1641 = vmatprep.subr.mxu1 %v2006_v0 }
  0xe0   :  { %1674 = vmatprep.subr.mxu0 %v2006_v0  ;;  %1642 = vmatpush3.msra.mxu1 %v2006_v0 }
  0xe1   :  { %1675 = vmatpush3.msra.mxu0 %v2007_v1  ;;  %1643 = vmatprep.mubr.msk.f32.mxu1 %vm2008_vm0, %v2006_v0 }
  0xe2   :  { %1676 = vmatprep.subr.mxu0 %v2006_v0  ;;  %1678 = vmatprep.mubr.msk.f32.mxu0 %vm2008_vm0, %v2006_v0 }
  0xe3   :  { %1677 = vmatpush3.msra.mxu0 %v2007_v1  ;;  %1681 = vmatprep.subr.mxu1 %v2006_v0 }
  0xe4   :  { %1644 = vmatmul.mubr.f32.vlgmr.msra.gmra.mxu1 %v2075_v7  ;;  %1679 = vmatmul.mubr.f32.vlgmr.msra.gmra.mxu0 %v2075_v7 }
  0xe5   :  { %1682 = vmatpush3.msra.mxu1 %v2007_v1  ;;  %1726 = vmatprep.subr.mxu0 %v2006_v0 }
  0xe6   :  { %1683 = vmatprep.subr.mxu1 %v2006_v0  ;;  %1727 = vmatpush3.msra.mxu0 %v2007_v1 }
  0xe7   :  { %1684 = vmatpush3.msra.mxu1 %v2007_v1  ;;  %1728 = vmatprep.subr.mxu0 %v2006_v0 }
  0xe8   :  { %1685 = vmatprep.subr.mxu1 %v2006_v0  ;;  %1729 = vmatpush3.msra.mxu0 %v2007_v1 }
  0xe9   :  { %1686 = vmatpush3.msra.mxu1 %v2007_v1  ;;  %1730 = vmatprep.subr.mxu0 %v2006_v0 }
  0xea   :  { %1687 = vmatprep.subr.mxu1 %v2006_v0  ;;  %1731 = vmatpush3.msra.mxu0 %v2007_v1 }
  0xeb   :  { %1688 = vmatpush3.msra.mxu1 %v2007_v1  ;;  %1732 = vmatprep.subr.mxu0 %v2006_v0 }
  0xec   :  { %1689 = vmatprep.subr.mxu1 %v2006_v0  ;;  %1733 = vmatpush3.msra.mxu0 %v2007_v1 }
  0xed   :  { %1690 = vmatpush3.msra.mxu1 %v2007_v1  ;;  %1734 = vmatprep.subr.mxu0 %v2006_v0 }
  0xee   :  { %1691 = vmatprep.subr.mxu1 %v2006_v0  ;;  %1735 = vmatpush3.msra.mxu0 %v2007_v1 }
  0xef   :  { %1692 = vmatpush3.msra.mxu1 %v2007_v1  ;;  %1736 = vmatprep.subr.mxu0 %v2006_v0 }
  0xf0   :  { %1693 = vmatprep.subr.mxu1 %v2006_v0  ;;  %1737 = vmatpush3.msra.mxu0 %v2007_v1 }
  0xf1   :  { %1694 = vmatpush3.msra.mxu1 %v2007_v1  ;;  %1738 = vmatprep.subr.mxu0 %v2006_v0 }
  0xf2   :  { %1695 = vmatprep.subr.mxu1 %v2006_v0  ;;  %1739 = vmatpush3.msra.mxu0 %v2007_v1 }
  0xf3   :  { %1696 = vmatpush3.msra.mxu1 %v2007_v1  ;;  %1740 = vmatprep.subr.mxu0 %v2006_v0 }
  0xf4   :  { %1697 = vmatprep.subr.mxu1 %v2006_v0  ;;  %1741 = vmatpush3.msra.mxu0 %v2007_v1 }
  0xf5   :  { %1698 = vmatpush3.msra.mxu1 %v2007_v1  ;;  %1742 = vmatprep.subr.mxu0 %v2006_v0 }
  0xf6   :  { %1699 = vmatprep.subr.mxu1 %v2006_v0  ;;  %1743 = vmatpush3.msra.mxu0 %v2007_v1 }
  0xf7   :  { %1700 = vmatpush3.msra.mxu1 %v2007_v1  ;;  %1744 = vmatprep.subr.mxu0 %v2006_v0 }
  0xf8   :  { %1701 = vmatprep.subr.mxu1 %v2006_v0  ;;  %1745 = vmatpush3.msra.mxu0 %v2007_v1 }
  0xf9   :  { %1702 = vmatpush3.msra.mxu1 %v2007_v1  ;;  %1746 = vmatprep.subr.mxu0 %v2006_v0 }
  0xfa   :  { %1703 = vmatprep.subr.mxu1 %v2006_v0  ;;  %1747 = vmatpush3.msra.mxu0 %v2007_v1 }
  0xfb   :  { %1704 = vmatpush3.msra.mxu1 %v2007_v1  ;;  %1748 = vmatprep.subr.mxu0 %v2006_v0 }
  0xfc   :  { %1705 = vmatprep.subr.mxu1 %v2006_v0  ;;  %1749 = vmatpush3.msra.mxu0 %v2007_v1 }
  0xfd   :  { %1706 = vmatpush3.msra.mxu1 %v2007_v1  ;;  %1750 = vmatprep.subr.mxu0 %v2006_v0 }
  0xfe   :  { %1707 = vmatprep.subr.mxu1 %v2006_v0  ;;  %1751 = vmatpush3.msra.mxu0 %v2007_v1 }
  0xff   :  { %1708 = vmatpush3.msra.mxu1 %v2007_v1  ;;  %1752 = vmatprep.subr.mxu0 %v2006_v0 }
 0x100   :  { %1709 = vmatprep.subr.mxu1 %v2006_v0  ;;  %1753 = vmatpush3.msra.mxu0 %v2007_v1 }
 0x101   :  { %1710 = vmatpush3.msra.mxu1 %v2007_v1  ;;  %1754 = vmatprep.subr.mxu0 %v2006_v0 }
 0x102   :  { %1711 = vmatprep.subr.mxu1 %v2006_v0  ;;  %1755 = vmatpush3.msra.mxu0 %v2007_v1 }
 0x103   :  { %1712 = vmatpush3.msra.mxu1 %v2007_v1  ;;  %1713 = vmatprep.mubr.msk.f32.mxu1 %vm2008_vm0, %v2006_v0 }
 0x104   :  { %1756 = vmatprep.subr.mxu0 %v2006_v0  ;;  %1714 = vmatmul.mubr.f32.vlgmr.msra.gmra.mxu1 %v547_v19 }
 0x105   :  { %1716 = vmatprep.subr.mxu1 %v2006_v0  ;;  %1757 = vmatpush3.msra.mxu0 %v2007_v1 }
 0x106   :  { %1758 = vmatprep.mubr.msk.f32.mxu0 %vm2008_vm0, %v2006_v0  ;;  %1717 = vmatpush3.msra.mxu1 %v2006_v0 }
 0x107   :  { %1759 = vmatmul.mubr.f32.vlgmr.msra.gmra.mxu0 %v545_v17  ;;  %1718 = vmatprep.mubr.msk.f32.mxu1 %vm2008_vm0, %v2006_v0 }
 0x108   :  { %1719 = vmatmul.mubr.f32.vlgmr.msra.gmra.mxu1 %v2198_v15  ;;  %1721 = vmatprep.subr.mxu1 %v2006_v0 }
 0x109   :  { %1722 = vmatpush3.msra.mxu1 %v2006_v0  ;;  %1723 = vmatprep.mubr.msk.f32.mxu1 %vm2008_vm0, %v2006_v0 }
 0x10a   :  { %1761 = vmatprep.subr.mxu1 %v2006_v0  ;;  %1801 = vmatprep.subr.mxu0 %v2006_v0 }
 0x10b   :  { %1802 = vmatpush3.msra.mxu0 %v2007_v1  ;;  %1833 = vmatprep.mubr.msk.f32.mxu0 %vm2008_vm0, %v2006_v0 }
 0x10c   :  { %1724 = vmatmul.mubr.f32.vlgmr.msra.gmra.mxu1 %v544_v16  ;;  %1803 = vmatprep.subr.mxu0 %v2006_v0 }
 0x10d   :  { %1762 = vmatpush3.msra.mxu1 %v2006_v0  ;;  %1763 = vmatprep.mubr.msk.f32.mxu1 %vm2008_vm0, %v2006_v0 }
 0x10e   :  { %1766 = vmatprep.subr.mxu1 %v2006_v0  ;;  %1804 = vmatpush3.msra.mxu0 %v2007_v1 }
 0x10f   :  { %1805 = vmatprep.subr.mxu0 %v2006_v0 }
 0x110   :  { %1764 = vmatmul.mubr.f32.vlgmr.msra.gmra.mxu1 %v2198_v15  ;;  %1806 = vmatpush3.msra.mxu0 %v2007_v1 }
 0x111   :  { %1767 = vmatpush3.msra.mxu1 %v2007_v1  ;;  %1807 = vmatprep.subr.mxu0 %v2006_v0 }
 0x112   :  { %1768 = vmatprep.subr.mxu1 %v2006_v0  ;;  %1808 = vmatpush3.msra.mxu0 %v2007_v1 }
 0x113   :  { %1769 = vmatpush3.msra.mxu1 %v2007_v1  ;;  %1809 = vmatprep.subr.mxu0 %v2006_v0 }
 0x114   :  { %1770 = vmatprep.subr.mxu1 %v2006_v0  ;;  %1810 = vmatpush3.msra.mxu0 %v2007_v1 }
 0x115   :  { %1771 = vmatpush3.msra.mxu1 %v2007_v1  ;;  %1811 = vmatprep.subr.mxu0 %v2006_v0 }
 0x116   :  { %1772 = vmatprep.subr.mxu1 %v2006_v0  ;;  %1812 = vmatpush3.msra.mxu0 %v2007_v1 }
 0x117   :  { %1773 = vmatpush3.msra.mxu1 %v2007_v1  ;;  %1813 = vmatprep.subr.mxu0 %v2006_v0 }
 0x118   :  { %1774 = vmatprep.subr.mxu1 %v2006_v0  ;;  %1814 = vmatpush3.msra.mxu0 %v2007_v1 }
 0x119   :  { %1775 = vmatpush3.msra.mxu1 %v2007_v1  ;;  %1815 = vmatprep.subr.mxu0 %v2006_v0 }
 0x11a   :  { %1776 = vmatprep.subr.mxu1 %v2006_v0  ;;  %1816 = vmatpush3.msra.mxu0 %v2007_v1 }
 0x11b   :  { %1777 = vmatpush3.msra.mxu1 %v2007_v1  ;;  %1817 = vmatprep.subr.mxu0 %v2006_v0 }
 0x11c   :  { %1778 = vmatprep.subr.mxu1 %v2006_v0  ;;  %1818 = vmatpush3.msra.mxu0 %v2007_v1 }
 0x11d   :  { %1779 = vmatpush3.msra.mxu1 %v2007_v1  ;;  %1819 = vmatprep.subr.mxu0 %v2006_v0 }
 0x11e   :  { %1780 = vmatprep.subr.mxu1 %v2006_v0  ;;  %1820 = vmatpush3.msra.mxu0 %v2007_v1 }
 0x11f   :  { %1781 = vmatpush3.msra.mxu1 %v2007_v1  ;;  %1821 = vmatprep.subr.mxu0 %v2006_v0 }
 0x120   :  { %1782 = vmatprep.subr.mxu1 %v2006_v0  ;;  %1822 = vmatpush3.msra.mxu0 %v2007_v1 }
 0x121   :  { %1783 = vmatpush3.msra.mxu1 %v2007_v1  ;;  %1823 = vmatprep.subr.mxu0 %v2006_v0 }
 0x122   :  { %1784 = vmatprep.subr.mxu1 %v2006_v0  ;;  %1824 = vmatpush3.msra.mxu0 %v2007_v1 }
 0x123   :  { %1785 = vmatpush3.msra.mxu1 %v2007_v1  ;;  %1825 = vmatprep.subr.mxu0 %v2006_v0 }
 0x124   :  { %1786 = vmatprep.subr.mxu1 %v2006_v0  ;;  %1826 = vmatpush3.msra.mxu0 %v2007_v1 }
 0x125   :  { %1787 = vmatpush3.msra.mxu1 %v2007_v1  ;;  %1827 = vmatprep.subr.mxu0 %v2006_v0 }
 0x126   :  { %1788 = vmatprep.subr.mxu1 %v2006_v0  ;;  %1828 = vmatpush3.msra.mxu0 %v2007_v1 }
 0x127   :  { %1789 = vmatpush3.msra.mxu1 %v2007_v1  ;;  %1829 = vmatprep.subr.mxu0 %v2006_v0 }
 0x128   :  { %1790 = vmatprep.subr.mxu1 %v2006_v0  ;;  %1798 = vmatprep.mubr.msk.f32.mxu1 %vm2008_vm0, %v2006_v0 }
 0x129   :  { %1791 = vmatpush3.msra.mxu1 %v2007_v1  ;;  %1830 = vmatpush3.msra.mxu0 %v2007_v1 }
 0x12a   :  { %1792 = vmatprep.subr.mxu1 %v2006_v0  ;;  %1831 = vmatprep.subr.mxu0 %v2006_v0 }
 0x12b   :  { %1793 = vmatpush3.msra.mxu1 %v2007_v1  ;;  %1832 = vmatpush3.msra.mxu0 %v2007_v1 }
 0x12c   :  { %1794 = vmatprep.subr.mxu1 %v2006_v0  ;;  %1834 = vmatmul.mubr.f32.vlgmr.msra.gmra.mxu0 %v982_v23 }
 0x12d   :  { %1795 = vmatpush3.msra.mxu1 %v2007_v1  ;;  %1886 = vmatprep.subr.mxu0 %v2006_v0 }
 0x12e   :  { %1796 = vmatprep.subr.mxu1 %v2006_v0  ;;  %1887 = vmatpush3.msra.mxu0 %v2007_v1 }
 0x12f   :  { %1797 = vmatpush3.msra.mxu1 %v2007_v1  ;;  %1888 = vmatprep.subr.mxu0 %v2006_v0 }
 0x130   :  { %1799 = vmatmul.mubr.f32.vlgmr.msra.gmra.mxu1 %v2198_v15  ;;  %1836 = vmatprep.subr.mxu1 %v2006_v0 }
 0x131   :  { %1837 = vmatpush3.msra.mxu1 %v2006_v0  ;;  %1838 = vmatprep.mubr.msk.f32.mxu1 %vm2008_vm0, %v2006_v0 }
 0x132   :  { %1841 = vmatprep.subr.mxu1 %v2006_v0  ;;  %1889 = vmatpush3.msra.mxu0 %v2007_v1 }
 0x133   :  { %1890 = vmatprep.subr.mxu0 %v2006_v0  ;;  %1918 = vmatprep.mubr.msk.f32.mxu0 %vm2008_vm0, %v2006_v0 }
 0x134   :  { %1839 = vmatmul.mubr.f32.vlgmr.msra.gmra.mxu1 %v2178_v13  ;;  %1891 = vmatpush3.msra.mxu0 %v2007_v1 }
 0x135   :  { %1842 = vmatpush3.msra.mxu1 %v2006_v0  ;;  %1843 = vmatprep.mubr.msk.f32.mxu1 %vm2008_vm0, %v2006_v0 }
 0x136   :  { %1846 = vmatprep.subr.mxu1 %v2006_v0  ;;  %1892 = vmatprep.subr.mxu0 %v2006_v0 }
 0x137   :  { %1893 = vmatpush3.msra.mxu0 %v2007_v1 }
 0x138   :  { %1844 = vmatmul.mubr.f32.vlgmr.msra.gmra.mxu1 %v2289_v20  ;;  %1894 = vmatprep.subr.mxu0 %v2006_v0 }
 0x139   :  { %1847 = vmatpush3.msra.mxu1 %v2007_v1  ;;  %1895 = vmatpush3.msra.mxu0 %v2007_v1 }
 0x13a   :  { %1848 = vmatprep.subr.mxu1 %v2006_v0  ;;  %1896 = vmatprep.subr.mxu0 %v2006_v0 }
 0x13b   :  { %1849 = vmatpush3.msra.mxu1 %v2007_v1  ;;  %1897 = vmatpush3.msra.mxu0 %v2007_v1 }
 0x13c   :  { %1850 = vmatprep.subr.mxu1 %v2006_v0  ;;  %1898 = vmatprep.subr.mxu0 %v2006_v0 }
 0x13d   :  { %1851 = vmatpush3.msra.mxu1 %v2007_v1  ;;  %1899 = vmatpush3.msra.mxu0 %v2007_v1 }
 0x13e   :  { %1852 = vmatprep.subr.mxu1 %v2006_v0  ;;  %1900 = vmatprep.subr.mxu0 %v2006_v0 }
 0x13f   :  { %1853 = vmatpush3.msra.mxu1 %v2007_v1  ;;  %1901 = vmatpush3.msra.mxu0 %v2007_v1 }
 0x140   :  { %1854 = vmatprep.subr.mxu1 %v2006_v0  ;;  %1902 = vmatprep.subr.mxu0 %v2006_v0 }
 0x141   :  { %1855 = vmatpush3.msra.mxu1 %v2007_v1  ;;  %1903 = vmatpush3.msra.mxu0 %v2007_v1 }
 0x142   :  { %1856 = vmatprep.subr.mxu1 %v2006_v0  ;;  %1904 = vmatprep.subr.mxu0 %v2006_v0 }
 0x143   :  { %1857 = vmatpush3.msra.mxu1 %v2007_v1  ;;  %1905 = vmatpush3.msra.mxu0 %v2007_v1 }
 0x144   :  { %1858 = vmatprep.subr.mxu1 %v2006_v0  ;;  %1906 = vmatprep.subr.mxu0 %v2006_v0 }
 0x145   :  { %1859 = vmatpush3.msra.mxu1 %v2007_v1  ;;  %1907 = vmatpush3.msra.mxu0 %v2007_v1 }
 0x146   :  { %1860 = vmatprep.subr.mxu1 %v2006_v0  ;;  %1908 = vmatprep.subr.mxu0 %v2006_v0 }
 0x147   :  { %1861 = vmatpush3.msra.mxu1 %v2007_v1  ;;  %1909 = vmatpush3.msra.mxu0 %v2007_v1 }
 0x148   :  { %1862 = vmatprep.subr.mxu1 %v2006_v0  ;;  %1910 = vmatprep.subr.mxu0 %v2006_v0 }
 0x149   :  { %1863 = vmatpush3.msra.mxu1 %v2007_v1  ;;  %1911 = vmatpush3.msra.mxu0 %v2007_v1 }
 0x14a   :  { %1864 = vmatprep.subr.mxu1 %v2006_v0  ;;  %1878 = vmatprep.mubr.msk.f32.mxu1 %vm2008_vm0, %v2006_v0 }
 0x14b   :  { %1865 = vmatpush3.msra.mxu1 %v2007_v1  ;;  %1912 = vmatprep.subr.mxu0 %v2006_v0 }
 0x14c   :  { %1866 = vmatprep.subr.mxu1 %v2006_v0  ;;  %1913 = vmatpush3.msra.mxu0 %v2007_v1 }
 0x14d   :  { %1867 = vmatpush3.msra.mxu1 %v2007_v1  ;;  %1914 = vmatprep.subr.mxu0 %v2006_v0 }
 0x14e   :  { %1868 = vmatprep.subr.mxu1 %v2006_v0  ;;  %1915 = vmatpush3.msra.mxu0 %v2007_v1 }
 0x14f   :  { %1869 = vmatpush3.msra.mxu1 %v2007_v1  ;;  %1916 = vmatprep.subr.mxu0 %v2006_v0 }
 0x150   :  { %1870 = vmatprep.subr.mxu1 %v2006_v0  ;;  %1917 = vmatpush3.msra.mxu0 %v2007_v1 }
 0x151   :  { %1871 = vmatpush3.msra.mxu1 %v2007_v1  ;;  %1919 = vmatmul.mubr.f32.vlgmr.msra.gmra.mxu0 %v2178_v13 }
 0x152   :  { %1872 = vmatprep.subr.mxu1 %v2006_v0 }
 0x153   :  { %1873 = vmatpush3.msra.mxu1 %v2007_v1 }
 0x154   :  { %1874 = vmatprep.subr.mxu1 %v2006_v0 }
 0x155   :  { %1875 = vmatpush3.msra.mxu1 %v2007_v1 }
 0x156   :  { %1876 = vmatprep.subr.mxu1 %v2006_v0 }
 0x157   :  { %1877 = vmatpush3.msra.mxu1 %v2007_v1 }
 0x158   :  { %1879 = vmatmul.mubr.f32.vlgmr.msra.gmra.mxu1 %v980_v21  ;;  %1881 = vmatprep.subr.mxu1 %v2006_v0 }
 0x159   :  { %1882 = vmatpush3.msra.mxu1 %v2006_v0  ;;  %1883 = vmatprep.mubr.msk.f32.mxu1 %vm2008_vm0, %v2006_v0 }
 0x15c   :  { %1884 = vmatmul.mubr.f32.vlgmr.msra.gmra.mxu1 %v2178_v13 }
 0x17b   :  { %v186_v24 = vpop.f32.mrf.mxu1 }
 0x17d   :  { %v1600_v25 = vpop.f32.mrf.mxu1 }
 0x17f   :  { %v258_v26 = vpop.f32.mrf.mxu1 }
 0x181   :  { %v1605_v27 = vpop.f32.mrf.mxu1 }
 0x183   :  { %v115_v28 = vpop.f32.mrf.mxu0 }
 0x184   :  { %v187_v29 = vadd.f32 %v186_v24, %v115_v28  ;;  %v1349_v24 = vlaneseq }
 0x185   :  { %v1595_v30 = vpop.f32.mrf.mxu0 }
 0x186   :  { %v259_v31 = vadd.f32 %v258_v26, %v187_v29  ;;  %v1350_v25 = vand.u32 127, %v1349_v24 }
 0x188   :  { %vm1353_vm1 = vcmp.eq.s32.totalorder %v1350_v25, 2  ;;  %vm1352_vm2 = vcmp.eq.s32.totalorder %v1350_v25, 1  ;;  %vm1351_vm3 = vcmp.eq.s32.totalorder %v1350_v25, 0 }
 0x19f   :  { %v331_v32 = vpop.f32.mrf.mxu1 }
 0x1a0   :  { %v332_v33 = vadd.f32 %v331_v32, %v259_v31 }
 0x1a1   :  { %v1640_v34 = vpop.f32.mrf.mxu1 }
 0x1a4   :  { %v402_v36 = vpop.f32.mrf.mxu1  ;;  %v473_v37 = vpop.f32.mrf.mxu0 }
 0x1a5   :  { %v403_v38 = vadd.f32 %v402_v36, %v332_v33 }
 0x1a6   :  { %v1645_v39 = vpop.f32.mrf.mxu1  ;;  %v1680_v40 = vpop.f32.mrf.mxu0 }
 0x1a7   :  { %v474_v41 = vadd.f32 %v473_v37, %v403_v38 }
 0x1a9   :  { %1932 = vrcp.f32 %v474_v41 }
 0x1b6   :  { %v1933_v60 = vpop.eup %1932 }
 0x1c4   :  { %v549_v42 = vpop.f32.mrf.mxu1 }
 0x1c6   :  { %v1715_v43 = vpop.f32.mrf.mxu1 }
 0x1c7   :  { %v765_v44 = vpop.f32.mrf.mxu0 }
 0x1c8   :  { %v620_v45 = vpop.f32.mrf.mxu1 }
 0x1c9   :  { %v1760_v46 = vpop.f32.mrf.mxu0  ;;  %v621_v47 = vadd.f32 %v620_v45, %v549_v42 }
 0x1ca   :  { %v1720_v48 = vpop.f32.mrf.mxu1 }
 0x1cc   :  { %v692_v49 = vpop.f32.mrf.mxu1 }
 0x1cd   :  { %v693_v50 = vadd.f32 %v692_v49, %v621_v47 }
 0x1ce   :  { %v1725_v51 = vpop.f32.mrf.mxu1 }
 0x1cf   :  { %v766_v52 = vadd.f32 %v765_v44, %v693_v50 }
 0x1d0   :  { %v836_v53 = vpop.f32.mrf.mxu1 }
 0x1d1   :  { %v837_v54 = vadd.f32 %v836_v53, %v766_v52 }
 0x1d2   :  { %v1765_v55 = vpop.f32.mrf.mxu1 }
 0x1ec   :  { %v984_v56 = vpop.f32.mrf.mxu0 }
 0x1ed   :  { %v985_v4 = vadd.f32 1e-06, %v984_v56 }
 0x1ee   :  { %v1835_v57 = vpop.f32.mrf.mxu0 }
 0x1f0   :  { %v907_v58 = vpop.f32.mrf.mxu1 }
 0x1f1   :  { %v908_v59 = vadd.f32 %v907_v58, %v837_v54 }
 0x1f2   :  { %v1800_v61 = vpop.f32.mrf.mxu1 }
 0x1f3   :  { %v912_v62 = vmul.f32 %v1933_v60, %v908_v59 }
 0x1f4   :  { %v1054_v63 = vpop.f32.mrf.mxu1 }
 0x1f5   :  { %v1055_v6 = vadd.f32 %v1054_v63, %v985_v4  ;;  %v913_v17 = vmul.f32 0.999999, %v912_v62 }
 0x1f6   :  { %v1840_v0 = vpop.f32.mrf.mxu1 }
 0x1f7   :  { %v1343_v20 = vmul.f32 2.0, %v913_v17 }
 0x1f8   :  { %v1125_v1 = vpop.f32.mrf.mxu1 }
 0x1f9   :  { %v1126_v8 = vadd.f32 %v1125_v1, %v1055_v6 }
 0x1fa   :  { %v1845_v2 = vpop.f32.mrf.mxu1 }
 0x211   :  { %v1337_v3 = vpop.f32.mrf.mxu0 }
 0x213   :  { %v1920_v5 = vpop.f32.mrf.mxu0 }
 0x218   :  { %v1197_v7 = vpop.f32.mrf.mxu1 }
 0x219   :  { %v1198_v10 = vadd.f32 %v1197_v7, %v1126_v8 }
 0x21a   :  { %v1880_v9 = vpop.f32.mrf.mxu1 }
 0x21c   :  { %v1267_v11 = vpop.f32.mrf.mxu1 }
 0x21d   :  { %v1268_v12 = vadd.f32 %v1267_v11, %v1198_v10 }
 0x21e   :  { %v1885_v13 = vpop.f32.mrf.mxu1 }
 0x21f   :  { %v1338_v14 = vadd.f32 %v1337_v3, %v1268_v12 }
 0x221   :  { %1934 = vrcp.f32 %v1338_v14 }
 0x22e   :  { %v1935_v15 = vpop.eup %1934 }
 0x22f   :  { %v1342_v16 = vmul.f32 %v1935_v15, %v912_v62 }
 0x231   :  { %1362 = vperm.xlu1 %1929, %v1342_v16   ;;  %v1345_v18 = vadd.f32 %v1342_v16, %v913_v17  ;;  %v1344_v21 = vmul.f32 %v1343_v20, %v1342_v16 }
 0x233   :  { %v1346_v19 = vadd.f32 1e-06, %v1345_v18 }
 0x235   :  { %1368 = vperm.xlu1 %1929, %v913_v17   ;;  %1936 = vrcp.f32 %v1346_v19 }
 0x242   :  { %v1937_v22 = vpop.eup %1936 }
 0x243   :  { %v1348_v23 = vmul.f32 %v1937_v22, %v1344_v21 }
 0x245   :  { %1356 = vperm.xlu0 %1928, %v1348_v23  }
 0x2ac   :  { %v1363_v26 = vpop.permute.xlu1 %1362 }
 0x2b0   :  { %v1369_v29 = vpop.permute.xlu1 %1368 }
 0x2c0   :  { %v1357_v27 = vpop.permute.xlu0 %1356 }
 0x2c1   :  { %v1359_v28 = vsel %vm1353_vm1, %v1357_v27, 0.0 }
 0x2c2   :  { %v1365_v30 = vsel %vm1352_vm2, %v1363_v26, %v1359_v28 }
 0x2c3   :  { %v1371_v31 = vsel %vm1351_vm3, %v1369_v29, %v1365_v30 }
 0x2c4   :  { %1373 = vst.msk [vmem:[#allocation7] sm:$0xff] %vm1372_vm4, %v1371_v31 }
 0x2c5   :  { %1989 = shalt.err (!%p1986_p0)
}
 0x2c6   :  { %1383 = dma.vmem_to_hbm [thread:$0]  %s1381_s1, 128, %s2422_s2, [#allocation4]  }
 0x2c7   :  { %2002 = dma.done.wait [#allocation4], 128  }
 0x2c8   :  { %2003 = vsyncadd [#allocation4], 4294967168 }
 0x2c9   :  { %1387 = vsyncpa [#allocation3], 1 }
 0x2ca   :  { %1388 = vsyncpa [#allocation6], 1 }
 0x2cb   :  { %1389 = vsyncpa [#allocation4], 1 }

</bundles_post_ra>
